<compile_context>
chip_gen: v7x
topology: tpu7x:2x2x1
jax: 0.10.0
libtpu: 0.0.40
codegen_flags: <defaults>
</compile_context>

<pallas_src>
import jax
import jax.numpy as jnp
from jax.experimental import pallas as pl
from jax.experimental.pallas import tpu as pltpu

H_NEURONS = 64
H_NEURONS2 = 16
OUT_SIZE = 1  # critic emits a single state value per row


def critic_kernel(x_ref, w1_ref, b1_ref, w2_ref, b2_ref, w3_ref, b3_ref, o_ref):
    # fc1 + ReLU  (bf16 operands on the MXU, f32 accumulation, f32 elementwise)
    h1 = jnp.dot(x_ref[...], w1_ref[...], preferred_element_type=jnp.float32)
    h1 = jnp.maximum(h1 + b1_ref[...], 0.0)
    # fc2 + ReLU  (f32; w2 is tiny and VMEM-resident, no bandwidth to save)
    h2 = jnp.dot(h1, w2_ref[...], preferred_element_type=jnp.float32)
    h2 = jnp.maximum(h2 + b2_ref[...], 0.0)
    # state_value head: [tb,16] x [16,1] as VPU multiply + cross-lane reduce
    # (skips an MXU pass that would use a single output column).
    v = jnp.sum(h2 * w3_ref[...], axis=-1, keepdims=True)
    o_ref[...] = v + b3_ref[...]


def _round_up(x, m):
    return (x + m - 1) // m * m


def critic_forward(x, params, *, batch_tile=2048, stream_dtype=jnp.bfloat16):
    """x: [B, state_size]. Returns [B, 1] float32 state values."""
    w1, b1, w2, b2, w3, b3 = params
    B, state_size = x.shape

    # Stream the dominant HBM traffic (x) and its matching weight in bf16;
    # everything downstream of the f32 accumulators stays f32.  In a real PPO
    # loop the upstream producer should emit bf16 so this cast fuses away.
    x = x.astype(stream_dtype)
    w1 = w1.astype(stream_dtype)
    b1 = b1.astype(jnp.float32)
    w2 = w2.astype(jnp.float32)
    b2 = b2.astype(jnp.float32)
    w3_row = w3.reshape(1, H_NEURONS2).astype(jnp.float32)  # head weight as a lane row
    b3 = b3.reshape(1, OUT_SIZE).astype(jnp.float32)

    # Batch tile: multiple of 8 sublanes, large enough to approach the HBM
    # roofline, but <= ceil(B/2) (rounded up to 8) so the grid has >= 2 steps
    # whenever possible and both v7x TensorCores get work.
    tb = min(batch_tile, max(8, _round_up(pl.cdiv(B, 2), 8)))
    grid = (pl.cdiv(B, tb),)  # ragged last block: Pallas pads input, masks output

    flops = 2 * B * (
        state_size * H_NEURONS + H_NEURONS * H_NEURONS2 + H_NEURONS2 * OUT_SIZE
    )
    weight_bytes = sum(
        int(p.size) * p.dtype.itemsize for p in (w1, b1, w2, b2, w3_row, b3)
    )
    bytes_accessed = (
        B * state_size * jnp.dtype(stream_dtype).itemsize  # x stream
        + B * OUT_SIZE * 4                                  # output
        + weight_bytes
    )

    out = pl.pallas_call(
        critic_kernel,
        out_shape=jax.ShapeDtypeStruct((B, OUT_SIZE), jnp.float32),
        grid=grid,
        in_specs=[
            # x: streamed one batch tile per grid step (double-buffered).
            pl.BlockSpec((tb, state_size), lambda i: (i, 0)),
            # Weights/biases: constant index_map -> VMEM-resident across steps.
            pl.BlockSpec((state_size, H_NEURONS), lambda i: (0, 0)),   # w1 (bf16)
            pl.BlockSpec((1, H_NEURONS), lambda i: (0, 0)),            # b1
            pl.BlockSpec((H_NEURONS, H_NEURONS2), lambda i: (0, 0)),   # w2
            pl.BlockSpec((1, H_NEURONS2), lambda i: (0, 0)),           # b2
            pl.BlockSpec((1, H_NEURONS2), lambda i: (0, 0)),           # w3 (row)
            pl.BlockSpec((1, OUT_SIZE), lambda i: (0, 0)),             # b3
        ],
        out_specs=pl.BlockSpec((tb, OUT_SIZE), lambda i: (i, 0)),
        compiler_params=pltpu.CompilerParams(
            dimension_semantics=("parallel",),
            # v5e's scoped-VMEM default is 16 MiB; the double-buffered tiles +
            # lane-padded temporaries at tb=2048-4096 want more headroom.
            vmem_limit_bytes=32 * 1024 * 1024,
        ),
        cost_estimate=pl.CostEstimate(
            flops=flops, transcendentals=0, bytes_accessed=int(bytes_accessed)
        ),
    )(x, w1, b1, w2, b2, w3_row, b3)

    return out


def init_critic_params(key, state_size):
    """Deterministic init mimicking nn.Linear's uniform(-1/sqrt(fan_in), 1/sqrt(fan_in)).
    Weights stored as [in, out] (transposed vs. PyTorch's [out, in])."""
    dims = [(state_size, H_NEURONS), (H_NEURONS, H_NEURONS2), (H_NEURONS2, OUT_SIZE)]
    params = []
    for (fan_in, fan_out) in dims:
        key, kw, kb = jax.random.split(key, 3)
        bound = 1.0 / jnp.sqrt(jnp.float32(fan_in))
        w = jax.random.uniform(kw, (fan_in, fan_out), jnp.float32, -bound, bound)
        b = jax.random.uniform(kb, (1, fan_out), jnp.float32, -bound, bound)
        params.extend([w, b])
    return tuple(params)


def critic_reference(x, params):
    """Pure-JAX f32 reference matching the PyTorch Critic forward."""
    w1, b1, w2, b2, w3, b3 = params
    h1 = jax.nn.relu(x @ w1 + b1)
    h2 = jax.nn.relu(h1 @ w2 + b2)
    return h2 @ w3 + b3


if __name__ == "__main__":
    batch = 24          # not a multiple of the tile -> exercises ragged masking
    state_size = 32

    key = jax.random.PRNGKey(0)
    key, kx = jax.random.split(key)
    x = jax.random.normal(kx, (batch, state_size), dtype=jnp.float32)

    params = init_critic_params(key, state_size)

    fwd = jax.jit(critic_forward)
    out = jax.block_until_ready(fwd(x, params))

    ref = critic_reference(x, params)
    assert out.shape == (batch, OUT_SIZE), out.shape
    # bf16 streaming of x/w1 -> loosened tolerance vs the pure-f32 reference.
    assert jnp.allclose(out, ref, atol=1e-2, rtol=1e-2), "mismatch vs reference"

    print("KERNEL_OK")
</pallas_src>

<mosaic_0001>
module attributes {stable_mosaic.version = 11 : i64} {
  func.func @critic_kernel(%arg0: i32, %arg1: memref<16x32xbf16, #tpu.memory_space<vmem>>, %arg2: memref<32x64xbf16, #tpu.memory_space<vmem>>, %arg3: memref<1x64xf32, #tpu.memory_space<vmem>>, %arg4: memref<64x16xf32, #tpu.memory_space<vmem>>, %arg5: memref<1x16xf32, #tpu.memory_space<vmem>>, %arg6: memref<1x16xf32, #tpu.memory_space<vmem>>, %arg7: memref<1x1xf32, #tpu.memory_space<vmem>>, %arg8: memref<16x1xf32, #tpu.memory_space<vmem>>) attributes {dimension_semantics = [#tpu.dimension_semantics<parallel>], iteration_bounds = array<i64: 2>, scalar_prefetch = 0 : i64, scratch_operands = 0 : i64, tpu.core_type = #tpu.core_type<tc>, window_params = [{transform_indices = @transform_0, window_bounds = array<i64: 16, 32>}, {pipeline_mode = #tpu.pipeline_mode<synchronous>, transform_indices = @transform_1, window_bounds = array<i64: 32, 64>}, {pipeline_mode = #tpu.pipeline_mode<synchronous>, transform_indices = @transform_2, window_bounds = array<i64: 1, 64>}, {pipeline_mode = #tpu.pipeline_mode<synchronous>, transform_indices = @transform_3, window_bounds = array<i64: 64, 16>}, {pipeline_mode = #tpu.pipeline_mode<synchronous>, transform_indices = @transform_4, window_bounds = array<i64: 1, 16>}, {pipeline_mode = #tpu.pipeline_mode<synchronous>, transform_indices = @transform_5, window_bounds = array<i64: 1, 16>}, {pipeline_mode = #tpu.pipeline_mode<synchronous>, transform_indices = @transform_6, window_bounds = array<i64: 1, 1>}, {transform_indices = @transform_7, window_bounds = array<i64: 16, 1>}]} {
    %c0 = arith.constant 0 : index
    %c0_0 = arith.constant 0 : index
    %0 = vector.load %arg1[%c0, %c0_0] : memref<16x32xbf16, #tpu.memory_space<vmem>>, vector<16x32xbf16>
    %c0_1 = arith.constant 0 : index
    %c0_2 = arith.constant 0 : index
    %1 = vector.load %arg2[%c0_1, %c0_2] : memref<32x64xbf16, #tpu.memory_space<vmem>>, vector<32x64xbf16>
    %cst = arith.constant dense<0.000000e+00> : vector<16x64xf32>
    %2 = tpu.matmul %0, %1, %cst {dimension_numbers = #tpu.dot_dimension_numbers<[1], [0], [0], [1], [0, 0, 1, 1], [], []>} : vector<16x32xbf16>, vector<32x64xbf16>, vector<16x64xf32> -> vector<16x64xf32>
    %c0_3 = arith.constant 0 : index
    %c0_4 = arith.constant 0 : index
    %3 = vector.load %arg3[%c0_3, %c0_4] : memref<1x64xf32, #tpu.memory_space<vmem>>, vector<1x64xf32>
    %4 = vector.broadcast %3 : vector<1x64xf32> to vector<16x64xf32>
    %5 = arith.addf %2, %4 : vector<16x64xf32>
    %cst_5 = arith.constant 0.000000e+00 : f32
    %6 = vector.broadcast %cst_5 : f32 to vector<16x64xf32>
    %7 = arith.maximumf %5, %6 : vector<16x64xf32>
    %c0_6 = arith.constant 0 : index
    %c0_7 = arith.constant 0 : index
    %8 = vector.load %arg4[%c0_6, %c0_7] : memref<64x16xf32, #tpu.memory_space<vmem>>, vector<64x16xf32>
    %cst_8 = arith.constant dense<0.000000e+00> : vector<16x16xf32>
    %9 = tpu.matmul %7, %8, %cst_8 {dimension_numbers = #tpu.dot_dimension_numbers<[1], [0], [0], [1], [0, 0, 1, 1], [], []>} : vector<16x64xf32>, vector<64x16xf32>, vector<16x16xf32> -> vector<16x16xf32>
    %c0_9 = arith.constant 0 : index
    %c0_10 = arith.constant 0 : index
    %10 = vector.load %arg5[%c0_9, %c0_10] : memref<1x16xf32, #tpu.memory_space<vmem>>, vector<1x16xf32>
    %11 = vector.broadcast %10 : vector<1x16xf32> to vector<16x16xf32>
    %12 = arith.addf %9, %11 : vector<16x16xf32>
    %cst_11 = arith.constant 0.000000e+00 : f32
    %13 = vector.broadcast %cst_11 : f32 to vector<16x16xf32>
    %14 = arith.maximumf %12, %13 : vector<16x16xf32>
    %c0_12 = arith.constant 0 : index
    %c0_13 = arith.constant 0 : index
    %15 = vector.load %arg6[%c0_12, %c0_13] : memref<1x16xf32, #tpu.memory_space<vmem>>, vector<1x16xf32>
    %16 = vector.broadcast %15 : vector<1x16xf32> to vector<16x16xf32>
    %17 = arith.mulf %14, %16 : vector<16x16xf32>
    %cst_14 = arith.constant dense<0.000000e+00> : vector<16xf32>
    %18 = vector.multi_reduction <add>, %17, %cst_14 [1] : vector<16x16xf32> to vector<16xf32>
    %19 = vector.shape_cast %18 : vector<16xf32> to vector<16x1xf32>
    %c0_15 = arith.constant 0 : index
    %c0_16 = arith.constant 0 : index
    %20 = vector.load %arg7[%c0_15, %c0_16] : memref<1x1xf32, #tpu.memory_space<vmem>>, vector<1x1xf32>
    %21 = vector.broadcast %20 : vector<1x1xf32> to vector<16x1xf32>
    %22 = arith.addf %19, %21 : vector<16x1xf32>
    %c0_17 = arith.constant 0 : index
    %c0_18 = arith.constant 0 : index
    %23 = vector.load %arg8[%c0_17, %c0_18] : memref<16x1xf32, #tpu.memory_space<vmem>>, vector<16x1xf32>
    tpu.vector_store %arg8[%c0_17, %c0_18], %22 {strides = array<i32>} : memref<16x1xf32, #tpu.memory_space<vmem>>, vector<16x1xf32>,
    return
  }
  func.func @transform_0(%arg0: i32) -> (i32, i32) {
    %c0_i32 = arith.constant 0 : i32
    %c0_i32_0 = arith.constant 0 : i32
    return %arg0, %c0_i32 : i32, i32
  }
  func.func @transform_1(%arg0: i32) -> (i32, i32) {
    %c0_i32 = arith.constant 0 : i32
    %c0_i32_0 = arith.constant 0 : i32
    %c0_i32_1 = arith.constant 0 : i32
    return %c0_i32, %c0_i32_0 : i32, i32
  }
  func.func @transform_2(%arg0: i32) -> (i32, i32) {
    %c0_i32 = arith.constant 0 : i32
    %c0_i32_0 = arith.constant 0 : i32
    %c0_i32_1 = arith.constant 0 : i32
    return %c0_i32, %c0_i32_0 : i32, i32
  }
  func.func @transform_3(%arg0: i32) -> (i32, i32) {
    %c0_i32 = arith.constant 0 : i32
    %c0_i32_0 = arith.constant 0 : i32
    %c0_i32_1 = arith.constant 0 : i32
    return %c0_i32, %c0_i32_0 : i32, i32
  }
  func.func @transform_4(%arg0: i32) -> (i32, i32) {
    %c0_i32 = arith.constant 0 : i32
    %c0_i32_0 = arith.constant 0 : i32
    %c0_i32_1 = arith.constant 0 : i32
    return %c0_i32, %c0_i32_0 : i32, i32
  }
  func.func @transform_5(%arg0: i32) -> (i32, i32) {
    %c0_i32 = arith.constant 0 : i32
    %c0_i32_0 = arith.constant 0 : i32
    %c0_i32_1 = arith.constant 0 : i32
    return %c0_i32, %c0_i32_0 : i32, i32
  }
  func.func @transform_6(%arg0: i32) -> (i32, i32) {
    %c0_i32 = arith.constant 0 : i32
    %c0_i32_0 = arith.constant 0 : i32
    %c0_i32_1 = arith.constant 0 : i32
    return %c0_i32, %c0_i32_0 : i32, i32
  }
  func.func @transform_7(%arg0: i32) -> (i32, i32) {
    %c0_i32 = arith.constant 0 : i32
    %c0_i32_0 = arith.constant 0 : i32
    return %arg0, %c0_i32 : i32, i32
  }
}

</mosaic_0001>

<bundles_post_ra>
// kernel: critic_forward.1
= control target key start
LH: loop header
LB: loop body
LE: loop exit
PB: predicated region body
PF: predicated region fallthrough
CT: control target
= control target key end

     0   :  { %s1167_s0 = inlined_call_operand.vmem [shape: bf16[24,32], index: 0, kind: input, shape index: {}]   ;;  %s1168_s1 = inlined_call_operand.vmem [shape: bf16[32,64], index: 1, kind: input, shape index: {}]   ;;  %s1169_s2 = inlined_call_operand.vmem [shape: f32[1,64], index: 2, kind: input, shape index: {}]   ;;  %s1170_s3 = inlined_call_operand.vmem [shape: f32[64,16], index: 3, kind: input, shape index: {}]   ;;  %s1171_s4 = inlined_call_operand.vmem [shape: f32[1,16], index: 4, kind: input, shape index: {}]   ;;  %s1172_s5 = inlined_call_operand.vmem [shape: f32[1,16], index: 5, kind: input, shape index: {}]   ;;  %s1173_s6 = inlined_call_operand.<no memory space> [shape: f32[1,1], index: 6, kind: input, shape index: {}]   ;;  %s1174_s7 = inlined_call_operand.vmem [shape: f32[24,1], index: 7, kind: output, shape index: {}]  }
   0x1   :  { %v12_v0 = vstv %s1173_s6 }
   0x2   :  { %13 = vst [vmem:[#allocation2] sm:$0x1] %v12_v0 }
   0x3   :  { %s1045_s26 = smov 0   ;;  %s1047_s27 = smov 0  }
   0x4   :  { %s1049_s28 = smov 0  }
   0x5 LB: > { %s1058_s6 = sadd.s32 4294967295, %s966_s28   ;;  %s1060_s29 = sadd.s32 1, %s966_s28   ;;  %s966_s28 = sphi %s1049_s28, %s1178_s28   ;;  %s962_s27 = sphi %s1047_s27, %s1177_s27   ;;  %s958_s26 = sphi %s1045_s26, %s1176_s26  }
   0x6   : > { %s175_s30 = ssub.s32 %s966_s28, %s1060_s29  ;;  %s178_s8 = sadd.s32 1, %s962_s27 }
   0x7   : > { %p176_p0 = scmp.eq.s32.totalorder %s175_s30, 0  ;;  %p188_p1 = scmp.ne.s32.totalorder %s962_s27, %s958_s26 }
   0x8   : > { %p189_p2 = scmp.eq.s32.totalorder %s1058_s6, 1  ;;  %p729_p3 = scmp.ge.s32.totalorder %s966_s28, 1 }
   0x9   : > { %s1068_s9 = scalar_select %p176_p0, %s962_s27, %s178_s8  }
   0xa   : > { %p1070_p4 = por %p189_p2, %p188_p1  ;;  %p248_p5 = scmp.lt.s32.totalorder %s966_s28, 3 }
   0xc   : > { %p249_p6 = pnand %p729_p3, %p248_p5 }
   0xd   : > { %v909_v1 = vld [vmem:[%s1168_s1] sm:$0xff] (!%p249_p6)   ;;  %v1000_v2 = vmov (!%p249_p6), 0.0   ;;  %v910_v3 = vld [vmem:[%s1168_s1 + $0x8] sm:$0xff] (!%p249_p6)   ;;  %vm1001_vm0 = vmmov (!%p249_p6), 0   ;;  %s1081_s15 = sshll.u32 (!%p249_p6), %s1058_s6, 1  ;;  %v382_v6 = vld [vmem:[%s1170_s3 + $0x10] sm:$0xff] (!%p249_p6) }
   0xe   : > { %252 = sbr.rel (%p249_p6) target bundleno = 662 (0x296), region = 48  ;;  %776 = vmatprep.subr.bf16.mxu0 (!%p249_p6), %v1000_v2  ;;  %780 = vmatprep.mubr.msk.bf16.mxu0 (!%p249_p6), %vm1001_vm0, %v1000_v2  ;;  %v380_v4 = vld [vmem:[%s1170_s3] sm:$0xff] (!%p249_p6)  ;;  %v381_v5 = vld [vmem:[%s1170_s3 + $0x8] sm:$0xff] (!%p249_p6)  ;;  %p288_p7 = scmp.lt.s32.totalorder (!%p249_p6), %s1081_s15, 2  ;;  %v383_v8 = vld [vmem:[%s1170_s3 + $0x18] sm:$0xff] (!%p249_p6)  ;;  %vm333_vm1 = vcmask (!%p249_p6), 261120  }
   0xf   : > { %777 = vmatpush3.bf16.msra.mxu0 (!%p249_p6), %v909_v1  ;;  %v803_v7 = vpack.c.bf16 (!%p249_p6), %v381_v5, %v380_v4  ;;  %v807_v9 = vpack.c.bf16 (!%p249_p6), %v383_v8, %v382_v6  ;;  %v384_v10 = vld [vmem:[%s1170_s3 + $0x20] sm:$0xff] (!%p249_p6)  ;;  %v385_v11 = vld [vmem:[%s1170_s3 + $0x28] sm:$0xff] (!%p249_p6)  ;;  %v386_v14 = vld [vmem:[%s1170_s3 + $0x30] sm:$0xff] (!%p249_p6)  ;;  %vm395_vm2 = vcmask (!%p249_p6), 523264   ;;  %vm488_vm3 = vcmask (!%p249_p6), 130048   ;;  %s280_s28 = sand.u32 (!%p249_p6), 1, %s958_s26  }
  0x10   : > { %778 = vmatprep.subr.bf16.mxu0 (!%p249_p6), %v1000_v2  ;;  %v811_v12 = vpack.c.bf16 (!%p249_p6), %v385_v11, %v384_v10  ;;  %v387_v15 = vld [vmem:[%s1170_s3 + $0x38] sm:$0xff] (!%p249_p6)  ;;  %v733_v17 = vld [vmem:[%s1169_s2] ss:$0 sm:$0xff] (!%p249_p6)  ;;  %s730_s30 = sshll.u32 (!%p249_p6), %s280_s28, 4  ;;  %vm504_vm4 = vcmask (!%p249_p6), 7168  }
  0x11   : > { %804 = vmatprep.subr.bf16.mxu1 (!%p249_p6), %v803_v7  ;;  %v815_v16 = vpack.c.bf16 (!%p249_p6), %v387_v15, %v386_v14  ;;  %v738_v26 = vld [vmem:[%s1171_s4] ss:$0 sm:$0xff] (!%p249_p6) }
  0x12   : > { %806 = vmatpush3.bf16.msra.mxu1 (!%p249_p6), %v803_v7  ;;  %v741_v31 = vld [vmem:[%s1172_s5] ss:$0 sm:$0xff] (!%p249_p6) }
  0x13   : > { %779 = vmatpush3.bf16.msra.mxu0 (!%p249_p6), %v910_v3  ;;  %808 = vmatprep.subr.bf16.mxu1 (!%p249_p6), %v807_v9  ;;  %v742_v38 = vld [vmem:[#allocation2] ss:$0 sm:$0xff] (!%p249_p6) }
  0x15   : > { %s289_s8 = scalar_select %p288_p7, %s1081_s15, 2 }
  0x16   : > { %810 = vmatpush3.bf16.msra.mxu1 %v807_v9  ;;  %s760_s26 = sshll.u32 (%p1070_p4), %s1058_s6, 4 }
  0x17   : > { %s732_s11 = sshll.u32 %s289_s8, 2  ;;  %812 = vmatprep.subr.bf16.mxu1 %v811_v12  ;;  %s1122_s8 = scalar_lea.vmem [#allocation3], %s730_s30  }
  0x18   : > { %s291_s14 = scalar_lea.vmem %s1167_s0, %s732_s11  ;;  %s515_s11 = ssub.s32 (%p1070_p4), 3, %s1081_s15 }
  0x19   : > { %v911_v13 = vld [vmem:[%s291_s14] sm:$0xff]   ;;  %p516_p8 = scmp.lt.s32.totalorder (%p1070_p4), %s515_s11, 2  ;;  %s1133_s14 = scalar_lea.vmem (%p1070_p4), %s1174_s7, %s760_s26  }
  0x1a   : > { %781 = vmatmul.mubr.msk.bf16.vlgmr.msra.gmra.mrb[0].mxu0 %vm333_vm1, %v911_v13  ;;  %814 = vmatpush3.bf16.msra.mxu1 %v811_v12 }
  0x1b   : > { %816 = vmatprep.subr.bf16.mxu1 %v815_v16 }
  0x1e   : > { %818 = vmatpush3.bf16.msra.mxu1 %v815_v16 }
  0xed   : > { %v371_v18 = vpop.f32.mrb[0].mxu0 }
  0xee   : > { %v372_v19 = vadd.f32 %v733_v17, %v371_v18  ;;  %v782_v20 = vpop.f32.mrb[1].mxu0 }
  0xef   : > { %v374_v21 = vpop.f32.mrb[2].mxu0 }
  0xf0   : > { %v378_v22 = vmax.f32 %v372_v19, 0.0  ;;  %v375_v23 = vadd.f32 %v733_v17, %v374_v21  ;;  %v783_v24 = vpop.f32.mrb[3].mxu0 }
  0xf2   : > { %v379_v25 = vmax.f32 %v375_v23, 0.0  ;;  %800 = vmatprep.mubr.msk.f32.mxu1 %vm395_vm2, %v378_v22 }
  0xf4   : > { %801 = vmatmul.mubr.msk.f32.vlgmr.msra.gmra.mrb[0].mxu1 %vm395_vm2, %v379_v25 }
 0x1c7   : > { %v802_v27 = vpop.f32.mrb[0].mxu1 }
 0x1c8   : > { %v474_v28 = vadd.f32 %v802_v27, %v738_v26  ;;  %v468_v29 = vpop.f32.mrb[1].mxu1 }
 0x1c9   : > { %v469_v30 = vadd.f32 %v738_v26, %v468_v29 }
 0x1ca   : > { %v478_v32 = vmax.f32 %v474_v28, 0.0 }
 0x1cb   : > { %v477_v33 = vmax.f32 %v469_v30, 0.0 }
 0x1cc   : > { %v487_v36 = vmul.f32 %v741_v31, %v478_v32 }
 0x1cd   : > { %v486_v34 = vmul.f32 %v741_v31, %v477_v33 }
 0x1ce   : > { %v492_v37 = vsel %vm488_vm3, %v487_v36, 0.0 }
 0x1cf   : > { %v489_v35 = vsel %vm488_vm3, %v486_v34, 0.0 }
 0x1d0   : > { %490 = vadd.xlane.f32.xlu0 %v489_v35 }
 0x1d4   : > { %493 = vadd.xlane.f32.xlu0 %v492_v37 }
 0x25d   : > { %v491_v39 = vpop.xlane.xlu0 %490 }
 0x25e   : > { %v502_v40 = vadd.f32 %v742_v38, %v491_v39  ;;  %513 = sbr.rel (!%p1070_p4) target bundleno = 662 (0x296), region = 52 }
 0x260   : > { %505 = vst.msk [vmem:[%s1122_s8] sm:$0xff] %vm504_vm4, %v502_v40 }
 0x261   : > { %v494_v41 = vpop.xlane.xlu0 %493 }
 0x262   : > { %v503_v42 = vadd.f32 %v742_v38, %v494_v41 }
 0x264   : > { %506 = vst.msk [vmem:[%s1122_s8 + $0x8] sm:$0xff] %vm504_vm4, %v503_v42 }
 0x265   : > { %s1180_s11 = smov (!%p516_p8, %s515_s11), 2 }
 0x266   : > { %s745_s16 = sshll.u32 %s1180_s11, 7 }
 0x267   : > { %p748_p9 = scmp.eq.s32.totalorder %s745_s16, 0 }
 0x268   : > { %s1139_s17 = sshrl.u32 (!%p748_p9), %s1180_s11, 1 }
 0x269   : > { %524 = sbr.rel (%p748_p9) target bundleno = 662 (0x296), region = 56  ;;  %p749_p10 = scmp.le.s32.totalorder (!%p748_p9), %s1139_s17, 0 }
 0x270   : > { %682 = sbr.rel (%p749_p10) target bundleno = 641 (0x281), region = 132  ;;  %s968_s6 = smov (!%p749_p10), %s1133_s14  }
 0x271   : > { %s972_s10 = smov (!%p749_p10), %s1122_s8   ;;  %s976_s15 = smov (!%p749_p10), 0  }
 0x272   : > { %s980_s18 = smov (!%p749_p10), 0  }
 0x277 LB: >> { %v588_v43 = vld [vmem:[%s974_s10] sm:$0xff]  ;;  %v590_v44 = vld [vmem:[%s974_s10 + $0x8] sm:$0xff]  ;;  %s592_s19 = sadd.s32 1, %s978_s15  ;;  %s582_s18 = sadd.s32 1, %s982_s18   ;;  %s982_s18 = sphi %s980_s18, %s582_s18   ;;  %s978_s15 = sphi %s976_s15, %s977_s15   ;;  %s974_s10 = sphi %s972_s10, %s597_s10   ;;  %s970_s6 = sphi %s968_s6, %s598_s6  }
 0x278   : >> { %589 = vst [vmem:[%s970_s6] sm:$0xff] %v588_v43  ;;  %591 = vst [vmem:[%s970_s6 + $0x8] sm:$0xff] %v590_v44  ;;  %p593_p11 = scmp.ge.s32.totalorder %s592_s19, %s1139_s17  ;;  %p581_p12 = scmp.ge.s32.totalorder %s582_s18, %s1139_s17 }
 0x27a   : >> { %s1182_s19 = smov (%p593_p11, %s592_s19), 0  ;;  %584 = sbr.rel (!%p581_p12) target bundleno = 631 (0x277), region = 138 }
 0x27b   : >> { %s750_s20 = sshll.u32 %s1182_s19, 4  ;;  %s977_s15 = smov %s1182_s19  }
 0x27c   : >> { %s597_s10 = scalar_lea.vmem %s1122_s8, %s750_s20 [#allocation3]   ;;  %s598_s6 = scalar_lea.vmem %s1133_s14, %s750_s20  }
 0x281 PF: > { %s1149_s21 = sand.u32 1, %s1180_s11   ;;  %s761_s22 = sshll.u32 %s1139_s17, 4 }
 0x282   : > { %s603_s23 = scalar_lea.vmem %s1122_s8, %s761_s22 [#allocation3]   ;;  %s605_s24 = scalar_lea.vmem %s1133_s14, %s761_s22  }
 0x283   : > { %p755_p13 = scmp.le.s32.totalorder %s1149_s21, 0 }
 0x284   : > { %s984_s25 = smov (!%p755_p13), %s605_s24   ;;  %s988_s28 = smov (!%p755_p13), %s603_s23  }
 0x285   : > { %696 = sbr.rel (%p755_p13) target bundleno = 662 (0x296), region = 143  ;;  %s992_s30 = smov (!%p755_p13), 0  }
 0x286   : > { %s996_s26 = smov (!%p755_p13), 0  }
 0x28c LB: >> { %v615_v45 = vld [vmem:[%s990_s28] sm:$0xff]  ;;  %s617_s11 = sadd.s32 1, %s994_s30  ;;  %s609_s26 = sadd.s32 1, %s998_s26   ;;  %s998_s26 = sphi %s996_s26, %s609_s26   ;;  %s994_s30 = sphi %s992_s30, %s993_s30   ;;  %s990_s28 = sphi %s988_s28, %s622_s28   ;;  %s986_s25 = sphi %s984_s25, %s623_s25  }
 0x28d   : >> { %616 = vst [vmem:[%s986_s25] sm:$0xff] %v615_v45  ;;  %p618_p0 = scmp.ge.s32.totalorder %s617_s11, %s1149_s21  ;;  %p608_p1 = scmp.ge.s32.totalorder %s609_s26, %s1149_s21 }
 0x28f   : >> { %s1184_s11 = smov (%p618_p0, %s617_s11), 0  ;;  %611 = sbr.rel (!%p608_p1) target bundleno = 652 (0x28c), region = 149 }
 0x290   : >> { %s756_s8 = sshll.u32 %s1184_s11, 3  ;;  %s993_s30 = smov %s1184_s11  }
 0x291   : >> { %s622_s28 = scalar_lea.vmem %s603_s23, %s756_s8 [#allocation3]   ;;  %s623_s25 = scalar_lea.vmem %s605_s24, %s756_s8  }
 0x296 PF: > { %p16_p2 = scmp.ge.s32.totalorder %s1060_s29, 4   ;;  %s1176_s26 = smov %s962_s27 }
 0x297   : > { %s1177_s27 = smov %s1068_s9  ;;  %s1178_s28 = smov %s1060_s29 }
 0x298   :  { %18 = sbr.rel (!%p16_p2) target bundleno = 5 (0x5), region = 160 }

</bundles_post_ra>
